<compile_context>
chip_gen: v5e
topology: v5e:2x2
jax: 0.10.0
libtpu: 0.0.40
codegen_flags: <defaults>
</compile_context>

<pallas_src>
import functools

import numpy as np
import jax
import jax.numpy as jnp
from jax import lax
from jax.experimental import pallas as pl
from jax.experimental.pallas import tpu as pltpu


def _round_up(x, m):
    return (x + m - 1) // m * m


# ConvTranspose2d(k=4, s=2, p=1) tap table:
#   output subpixel r uses (kernel row ky, padded-window row offset oy):
#     r=0 -> (ky=1, oy=1), (ky=3, oy=0) ; r=1 -> (ky=0, oy=2), (ky=2, oy=1)
_CONVT_TAPS = {0: ((1, 1), (3, 0)), 1: ((0, 2), (2, 1))}


# --------------------------------------------------------------------------
# one-time roll-direction probe (setup path only, cached per process)
# --------------------------------------------------------------------------
def _roll_probe_kernel(x_ref, o_ref):
    o_ref[...] = pltpu.roll(x_ref[...], 1, 1)


@functools.lru_cache(maxsize=None)
def _roll_sign():
    """Returns s such that pltpu.roll(t, (s*d) % M, axis=1)[m] == t[(m+d) % M].
    Runs once at setup time; NOT in the per-call path."""
    x = jnp.broadcast_to(jnp.arange(128, dtype=jnp.float32)[None, :], (8, 128))
    r = pl.pallas_call(
        _roll_probe_kernel,
        out_shape=jax.ShapeDtypeStruct((8, 128), jnp.float32))(x)
    # jnp.roll convention: out[i] = x[i - shift]  ->  out[0] == 127
    return -1 if bool(r[0, 0] == 127.0) else 1


# --------------------------------------------------------------------------
# fused decoder-block kernel
# --------------------------------------------------------------------------
def st_decoder_block_kernel(x_ref, m1_ref, m2_ref, w1_ref, b1_ref,
                            w3_ref, b3_ref, wt_ref, bt_ref, out_ref,
                            *, W, roll_sign):
    """Activations live transposed as (C, M); M = N*H*W on the 128-lane axis.

    Lane ordering is n*H*W + i*W + j.  The circular lane rolls below wrap
    across image/batch boundaries, but every wrapped lane is exactly a
    mask-zeroed boundary position, so results are unaffected.  This invariant
    requires the whole batch (all M lanes) in one grid step.
    """
    f32, bf16 = jnp.float32, jnp.bfloat16

    def windows3x3(t, mask_slab):
        # t: (C, M) f32.  Returns bf16 (9*C, M): the nine zero-padded 3x3 halo
        # windows (order dy*3+dx) stacked on sublanes, built with lane rotates
        # (XLU slot) and ONE full-slab boundary-mask multiply.
        C, M = t.shape
        wins = []
        for dy in range(3):
            for dx in range(3):
                d = (dy - 1) * W + (dx - 1)            # want win[m] = t[m + d]
                wins.append(pltpu.roll(t, (roll_sign * d) % M, 1) if d else t)
        slab = jnp.concatenate(wins, axis=0)           # (9*C, M) f32
        return (slab * mask_slab).astype(bf16)

    # ---- 1x1 conv + bias + ReLU --------------------------------------------
    # x arrives in its natural (M, Cin) flattening; contract Cin of both
    # operands (transposed-RHS dot, same dimension numbers as flash-attn qk^T)
    # so the result lands directly in the lane-dense (Cqp, M) layout.
    t1 = lax.dot_general(w1_ref[...], x_ref[...],
                         (((1,), (1,)), ((), ())),
                         preferred_element_type=f32)            # (Cqp, M)
    t1 = jnp.maximum(t1 + b1_ref[...], 0.0)

    # ---- 3x3 conv (pad=1) + bias + ReLU : ONE K=9*Cqp bf16 matmul ----------
    t2 = jnp.dot(w3_ref[...], windows3x3(t1, m1_ref[...]),
                 preferred_element_type=f32)                    # (Cmp, M)
    t2 = jnp.maximum(t2 + b3_ref[...], 0.0)

    # ---- ConvT(4, s=2, p=1) + bias + ReLU : all 4 subpixels, ONE matmul ----
    y = jnp.dot(wt_ref[...], windows3x3(t2, m2_ref[...]),
                preferred_element_type=f32)                     # (4*Co, M)
    out_ref[...] = jnp.maximum(y + bt_ref[...], 0.0)   # single lane-dense store


# --------------------------------------------------------------------------
# one-time host-side packing (hoisted out of the per-call path)
# --------------------------------------------------------------------------
@functools.lru_cache(maxsize=None)
def _window_masks(N, H, W):
    """(9, N*H*W) f32: mask[k, n*H*W + i*W + j] == 1 iff window k = dy*3+dx's
    source pixel (i+dy-1, j+dx-1) lies inside the image."""
    i = np.arange(H)[:, None]
    j = np.arange(W)[None, :]
    rows = []
    for dy in range(3):
        for dx in range(3):
            valid = ((i + dy - 1 >= 0) & (i + dy - 1 < H) &
                     (j + dx - 1 >= 0) & (j + dx - 1 < W))
            rows.append(np.tile(valid.reshape(-1), N))
    return np.stack(rows).astype(np.float32)


def _pack_decoder_params(params, input_shape):
    """Host-side (numpy) one-time re-layout of the block parameters into the
    transposed, channel-padded, tap-stacked matrices the kernel consumes."""
    w1, b1, w3, b3, wt, bt = (np.asarray(p, np.float32) for p in params)
    N, H, W, Cin = input_shape
    Cq, Cm, Co = w1.shape[1], w3.shape[2], wt.shape[2]
    Cqp, Cmp = _round_up(Cq, 8), _round_up(Cm, 8)

    # 1x1 conv (stage-1 weights stay f32: K=Cin matmul is negligible)
    w1t = np.zeros((Cqp, Cin), np.float32); w1t[:Cq] = w1.T
    b1t = np.zeros((Cqp, 1), np.float32);   b1t[:Cq] = b1.T

    # 3x3 conv: the 9 taps stacked along K -> (Cmp, 9*Cqp)
    w3p = np.zeros((9, Cqp, Cmp), np.float32); w3p[:, :Cq, :Cm] = w3
    w3t = np.ascontiguousarray(w3p.reshape(9 * Cqp, Cmp).T)
    b3t = np.zeros((Cmp, 1), np.float32); b3t[:Cm] = b3.T

    # ConvT: one (4*Co, 9*Cmp) matrix covering all 4 output subpixels
    wtt = np.zeros((4, Co, 9, Cmp), np.float32)
    for r in range(2):
        for s in range(2):
            idx = r * 2 + s
            for (ky, oy) in _CONVT_TAPS[r]:
                for (kx, ox) in _CONVT_TAPS[s]:
                    wtt[idx, :, oy * 3 + ox, :Cm] = wt[ky * 4 + kx].T
    wtt = wtt.reshape(4 * Co, 9 * Cmp)
    btt = np.tile(bt.T, (4, 1))                               # (4*Co, 1)

    # 3x3 boundary masks, pre-expanded to full (9*C, M) slabs per stage
    mask9 = _window_masks(N, H, W)                            # (9, N*H*W)
    m1 = np.repeat(mask9, Cqp, axis=0)
    m2 = np.repeat(mask9, Cmp, axis=0)

    return (jnp.asarray(m1), jnp.asarray(m2),
            jnp.asarray(w1t), jnp.asarray(b1t),
            jnp.asarray(w3t, jnp.bfloat16), jnp.asarray(b3t),
            jnp.asarray(wtt, jnp.bfloat16), jnp.asarray(btt))


# --------------------------------------------------------------------------
# per-call forward (single jit region: reshape -> pallas_call -> de-interleave)
# --------------------------------------------------------------------------
def _st_decoder_block_fwd(x, packed, *, roll_sign):
    N, H, W, Cin = x.shape
    mask1, mask2, w1t, b1t, w3t, b3t, wtt, btt = packed
    Co = wtt.shape[0] // 4
    M = N * H * W
    # Masks / packed layout are tied to this exact (N,H,W) lane flattening.
    assert mask1.shape[-1] == M and w1t.shape[-1] == Cin

    x_flat = x.reshape(M, Cin)            # pure reshape, NO wrapper transpose

    operands = (x_flat, mask1, mask2, w1t, b1t, w3t, b3t, wtt, btt)
    flops = 2 * M * (w1t.shape[0] * Cin + w3t.shape[0] * w3t.shape[1]
                     + wtt.shape[0] * wtt.shape[1])
    bytes_accessed = (sum(int(np.prod(op.shape)) * op.dtype.itemsize
                          for op in operands) + 4 * Co * M * 4)

    yt = pl.pallas_call(
        functools.partial(st_decoder_block_kernel, W=W, roll_sign=roll_sign),
        out_shape=jax.ShapeDtypeStruct((4 * Co, M), jnp.float32),
        grid_spec=pltpu.PrefetchScalarGridSpec(
            num_scalar_prefetch=0,
            # Whole batch in one step (M = 128 lanes).  For larger M: grid over
            # image-aligned lane blocks (>=256 lanes on v6e/v7x to fill the MXU)
            # marked "parallel" to engage v7x's second TensorCore.
            grid=(1,),
            in_specs=[pl.BlockSpec(op.shape, lambda i: (0, 0))
                      for op in operands],
            out_specs=pl.BlockSpec((4 * Co, M), lambda i: (0, 0)),
        ),
        compiler_params=pltpu.CompilerParams(
            dimension_semantics=("arbitrary",)),
        cost_estimate=pl.CostEstimate(flops=flops, transcendentals=0,
                                      bytes_accessed=bytes_accessed),
    )(*operands)

    # glue: de-interleave the 4 subpixel planes (row block idx=r*2+s -> (2i+r, 2j+s))
    y = yt.reshape(2, 2, Co, N, H, W)          # (r, s, c, n, i, j)
    y = y.transpose(3, 4, 0, 5, 1, 2)          # (n, i, r, j, s, c)
    return y.reshape(N, 2 * H, 2 * W, Co)


def make_st_decoder_block(params, input_shape):
    """One-time setup: host-side repack + roll probe + jitted forward closure."""
    packed = _pack_decoder_params(params, input_shape)
    fwd = jax.jit(functools.partial(_st_decoder_block_fwd,
                                    roll_sign=_roll_sign()))
    return lambda x: fwd(x, packed)


# --------------------------------------------------------------------------
# pure-JAX reference (NHWC) matching the PyTorch forward
# --------------------------------------------------------------------------
def reference(x, params):
    w1, b1, w3, b3, wt, bt = params
    dn = ('NHWC', 'HWIO', 'NHWC')
    hp = lax.Precision.HIGHEST
    Cin = x.shape[-1]
    Cq = w1.shape[1]
    Cm = w3.shape[2]
    Co = wt.shape[2]

    t1 = jax.nn.relu(
        lax.conv_general_dilated(x, w1.reshape(1, 1, Cin, Cq), (1, 1),
                                 [(0, 0), (0, 0)], dimension_numbers=dn,
                                 precision=hp) + b1.reshape(1, 1, 1, Cq))
    t2 = jax.nn.relu(
        lax.conv_general_dilated(t1, w3.reshape(3, 3, Cq, Cm), (1, 1),
                                 [(1, 1), (1, 1)], dimension_numbers=dn,
                                 precision=hp) + b3.reshape(1, 1, 1, Cm))
    # ConvTranspose(k=4, s=2, p=1) == dilated conv with spatially flipped kernel
    wt_h = wt.reshape(4, 4, Cm, Co)[::-1, ::-1, :, :]
    y = lax.conv_general_dilated(t2, wt_h, (1, 1), [(2, 2), (2, 2)],
                                 lhs_dilation=(2, 2), dimension_numbers=dn,
                                 precision=hp)
    return jax.nn.relu(y + bt.reshape(1, 1, 1, Co))


if __name__ == "__main__":
    # StDecoderBlock(in_channels=16, middle_channels=8, out_channels=8,
    #                is_bottleneck=True, norm_type=None)
    N, H, W = 2, 8, 8
    Cin, Cm, Co = 16, 8, 8
    Cq = Cin // 4

    key = jax.random.PRNGKey(0)
    k = jax.random.split(key, 8)
    x = jax.random.normal(k[0], (N, H, W, Cin), jnp.float32)

    # deterministic synthetic parameters (flattened-HWIO layout)
    w1 = 0.1 * jax.random.normal(k[1], (Cin, Cq), jnp.float32)      # conv1x1
    b1 = 0.1 * jax.random.normal(k[2], (1, Cq), jnp.float32)
    w3 = 0.1 * jax.random.normal(k[3], (9, Cq, Cm), jnp.float32)    # conv3x3
    b3 = 0.1 * jax.random.normal(k[4], (1, Cm), jnp.float32)
    wt = 0.1 * jax.random.normal(k[5], (16, Cm, Co), jnp.float32)   # convT 4x4
    bt = 0.1 * jax.random.normal(k[6], (1, Co), jnp.float32)
    params = (w1, b1, w3, b3, wt, bt)

    apply_fn = make_st_decoder_block(params, x.shape)   # one-time setup
    out = jax.block_until_ready(apply_fn(x))

    ref = reference(x, params)
    assert out.shape == (N, 2 * H, 2 * W, Co), out.shape
    assert jnp.allclose(out, ref, rtol=1e-2, atol=1e-2), \
        float(jnp.max(jnp.abs(out - ref)))

    print("KERNEL_OK")
</pallas_src>

<mosaic_0001>
module attributes {stable_mosaic.version = 11 : i64} {
  func.func @_roll_probe_kernel(%arg0: memref<8x128xf32, #tpu.memory_space<vmem>>, %arg1: memref<8x128xf32, #tpu.memory_space<vmem>>) attributes {dimension_semantics = [], scalar_prefetch = 0 : i64, scratch_operands = 0 : i64, tpu.core_type = #tpu.core_type<tc>} {
    %c0 = arith.constant 0 : index
    %c0_0 = arith.constant 0 : index
    %0 = vector.load %arg0[%c0, %c0_0] : memref<8x128xf32, #tpu.memory_space<vmem>>, vector<8x128xf32>
    %c1_i32 = arith.constant 1 : i32
    %1 = tpu.dynamic_rotate %0 by %c1_i32 dim 1 : vector<8x128xf32>, i32 -> vector<8x128xf32>
    %c0_1 = arith.constant 0 : index
    %c0_2 = arith.constant 0 : index
    %2 = vector.load %arg1[%c0_1, %c0_2] : memref<8x128xf32, #tpu.memory_space<vmem>>, vector<8x128xf32>
    tpu.vector_store %arg1[%c0_1, %c0_2], %1 {strides = array<i32>} : memref<8x128xf32, #tpu.memory_space<vmem>>, vector<8x128xf32>,
    return
  }
}

</mosaic_0001>

<bundles_post_ra>
// kernel: tpu_custom_call.1
= control target key start
LH: loop header
LB: loop body
LE: loop exit
PB: predicated region body
PF: predicated region fallthrough
CT: control target
= control target key end

     0   :  { %6 = vsyncpa [#allocation3], 0  ;;  %s118_s0 = inlined_call_operand.hbm [shape: f32[8,128], index: 0, kind: input, shape index: {}]   ;;  %s119_s1 = inlined_call_operand.hbm [shape: f32[8,128], index: 1, kind: output, shape index: {}]  }
   0x1   :  { %7 = vsyncpa [#allocation4], 0  ;;  %s13_s8 = sshll.u32 %s118_s0, 4  ;;  %s99_s9 = smov [#allocation2]   ;;  %s14_s8 = int_to_ptr.hbm [resolvable:$true] %s13_s8 }
   0x2   :  { %s15_s10 = sshll.u32 %s99_s9, 4  ;;  %s16_s10 = int_to_ptr.vmem [resolvable:$true] %s15_s10 }
   0x3   :  { %18 = dma.hbm_to_vmem [thread:$0]  %s14_s8, 128, %s16_s10, [#allocation3]  }
   0x4   :  { %95 = dma.done.wait [#allocation3], 128  }
   0x5   :  { %96 = vsyncadd [#allocation3], 4294967168  ;;  %v23_v0 = vld [vmem:[#allocation2] sm:$0xff]  ;;  %s100_s11 = smov 1   ;;  %s101_s12 = smov [#allocation5]  }
   0x6   :  { %24 = vrot.lane.b32.xlu0 %v23_v0, %s100_s11  ;;  %s32_s13 = sshll.u32 %s101_s12, 4  ;;  %s34_s16 = sshll.u32 %s119_s1, 4  ;;  %s33_s13 = int_to_ptr.vmem [resolvable:$true] %s32_s13  ;;  %s35_s16 = int_to_ptr.hbm [resolvable:$true] %s34_s16 }
  0x78   :  { %v25_v1 = vpop.permute.xlu0 %24 }
  0x79   :  { %26 = vst [vmem:[#allocation5] sm:$0xff] %v25_v1 }
  0x7a   :  { %37 = dma.vmem_to_hbm [thread:$0]  %s33_s13, 128, %s35_s16, [#allocation4]  }
  0x7b   :  { %97 = dma.done.wait [#allocation4], 128  }
  0x7c   :  { %98 = vsyncadd [#allocation4], 4294967168 }
  0x7d   :  { %42 = vsyncpa [#allocation3], 1 }
  0x7e   :  { %43 = vsyncpa [#allocation4], 1 }

</bundles_post_ra>
